<compile_context>
chip_gen: v7x
topology: tpu7x:2x2x1
jax: 0.10.0
libtpu: 0.0.40
codegen_flags: <defaults>
</compile_context>

<pallas_src>
import jax
import jax.numpy as jnp
from jax.experimental import pallas as pl
from jax.experimental.pallas import tpu as pltpu

IN_PAD = 64      # 63 features padded to 64 (sublane/lane friendly)
H1 = 128
H2 = 64
C_PAD = 128      # class dim padded to a full lane width
NEG_BIG = -1e30  # bias for padded (fake) classes -> exp() == 0


def _round_up(x, m):
    return (x + m - 1) // m * m


def handgesture_kernel(x_ref, w1_ref, b1_ref, w2_ref, b2_ref, w3_ref, b3_ref,
                       o_ref):
    x = x_ref[...]                                                 # [TB, 64] bf16

    # fc1 + ReLU  (bf16 operands, f32 accumulate)
    h1 = jnp.dot(x, w1_ref[...], preferred_element_type=jnp.float32)
    h1 = jnp.maximum(h1 + b1_ref[...], 0.0)                        # [TB, 128] f32

    # fc2 + ReLU
    h2 = jnp.dot(h1.astype(jnp.bfloat16), w2_ref[...],
                 preferred_element_type=jnp.float32)
    h2 = jnp.maximum(h2 + b2_ref[...], 0.0)                        # [TB, 64] f32

    # fc3 (padded classes get bias -1e30 -> zero probability)
    logits = jnp.dot(h2.astype(jnp.bfloat16), w3_ref[...],
                     preferred_element_type=jnp.float32)
    logits = logits + b3_ref[...]                                  # [TB, 128] f32

    # softmax over the (padded) class axis -- identical to softmax over the
    # real classes because padded logits are ~ -1e30.
    m = jnp.max(logits, axis=-1, keepdims=True)
    e = jnp.exp(logits - m)
    denom = jnp.sum(e, axis=-1, keepdims=True)
    o_ref[...] = (e * pl.reciprocal(denom, approx=True)).astype(o_ref.dtype)


def hand_gesture_net(x, params, *, tb=1024):
    """x: [B, 63] float32.  params: dict of transposed weights / biases.

    Returns [B, num_classes] float32 softmax probabilities.
    """
    w1, b1, w2, b2, w3, b3 = (params["w1"], params["b1"], params["w2"],
                              params["b2"], params["w3"], params["b3"])
    B, F = x.shape
    C = w3.shape[1]

    # ---- layout plumbing (all zero-cost numerically) ----------------------
    # input features 63 -> 64; cast matmul operands to bf16
    x_p = jnp.zeros((B, IN_PAD), jnp.float32).at[:, :F].set(x)
    w1_p = jnp.zeros((IN_PAD, H1), jnp.float32).at[:F, :].set(w1)
    # class dim C -> 128: zero weight columns, large-negative bias padding
    w3_p = jnp.zeros((H2, C_PAD), jnp.float32).at[:, :C].set(w3)
    b3_p = jnp.full((1, C_PAD), NEG_BIG, jnp.float32).at[:, :C].set(b3)

    w1_bf = w1_p.astype(jnp.bfloat16)
    w2_bf = w2.astype(jnp.bfloat16)
    w3_bf = w3_p.astype(jnp.bfloat16)

    # ---- batch tiling ------------------------------------------------------
    # TB capped for v7x's 64 MiB VMEM; small batches collapse to one block.
    tb_eff = min(tb, _round_up(B, 8))
    b_pad = _round_up(B, tb_eff)
    if b_pad != B:
        x_p = jnp.zeros((b_pad, IN_PAD), jnp.float32).at[:B, :].set(x_p)
    x_bf = x_p.astype(jnp.bfloat16)

    grid = (b_pad // tb_eff,)
    const = lambda a: pl.BlockSpec(a.shape, lambda i: (0,) * a.ndim)

    out = pl.pallas_call(
        handgesture_kernel,
        out_shape=jax.ShapeDtypeStruct((b_pad, C_PAD), jnp.float32),
        grid=grid,
        in_specs=[
            pl.BlockSpec((tb_eff, IN_PAD), lambda i: (i, 0)),   # x (batch-tiled)
            const(w1_bf), const(b1),                            # fc1
            const(w2_bf), const(b2),                            # fc2
            const(w3_bf), const(b3_p),                          # fc3
        ],
        out_specs=pl.BlockSpec((tb_eff, C_PAD), lambda i: (i, 0)),
        compiler_params=pltpu.CompilerParams(
            dimension_semantics=("parallel",)),
    )(x_bf, w1_bf, b1, w2_bf, b2, w3_bf, b3_p)

    return out[:B, :C]


def init_params(key, input_size, num_classes):
    """Deterministic synthetic init (PyTorch nn.Linear shapes, pre-transposed)."""
    ks = jax.random.split(key, 6)

    def linear(kw, kb, fan_in, fan_out):
        bound = 1.0 / jnp.sqrt(fan_in)
        # PyTorch stores W as [out, in]; we keep it transposed [in, out].
        w = jax.random.uniform(kw, (fan_in, fan_out), jnp.float32, -bound, bound)
        b = jax.random.uniform(kb, (1, fan_out), jnp.float32, -bound, bound)
        return w, b

    w1, b1 = linear(ks[0], ks[1], input_size, H1)
    w2, b2 = linear(ks[2], ks[3], H1, H2)
    w3, b3 = linear(ks[4], ks[5], H2, num_classes)
    return {"w1": w1, "b1": b1, "w2": w2, "b2": b2, "w3": w3, "b3": b3}


if __name__ == "__main__":
    INPUT_SIZE = 21 * 3          # 63, as in the PyTorch script
    NUM_CLASSES = 10             # labels_to_index is empty upstream; pick small C
    BATCH = 8

    key = jax.random.PRNGKey(0)
    k_x, k_p = jax.random.split(key)
    x = jax.random.normal(k_x, (BATCH, INPUT_SIZE), dtype=jnp.float32)
    params = init_params(k_p, INPUT_SIZE, NUM_CLASSES)

    out = hand_gesture_net(x, params)
    out = jax.block_until_ready(out)

    # sanity: shape + softmax rows sum to ~1 (approx reciprocal + bf16 matmuls)
    assert out.shape == (BATCH, NUM_CLASSES)
    assert jnp.allclose(jnp.sum(out, axis=1), 1.0, atol=1e-2)

    # sanity vs. pure-JAX f32 reference
    def ref(xx, p):
        h = jnp.maximum(xx @ p["w1"] + p["b1"], 0.0)
        h = jnp.maximum(h @ p["w2"] + p["b2"], 0.0)
        lg = h @ p["w3"] + p["b3"]
        return jax.nn.softmax(lg, axis=1)
    assert jnp.allclose(out, ref(x, params), atol=5e-2)

    print("KERNEL_OK")
</pallas_src>

<mosaic_0001>
module attributes {stable_mosaic.version = 11 : i64} {
  func.func @handgesture_kernel(%arg0: i32, %arg1: memref<8x64xbf16, #tpu.memory_space<vmem>>, %arg2: memref<64x128xbf16, #tpu.memory_space<vmem>>, %arg3: memref<1x128xf32, #tpu.memory_space<vmem>>, %arg4: memref<128x64xbf16, #tpu.memory_space<vmem>>, %arg5: memref<1x64xf32, #tpu.memory_space<vmem>>, %arg6: memref<64x128xbf16, #tpu.memory_space<vmem>>, %arg7: memref<1x128xf32, #tpu.memory_space<vmem>>, %arg8: memref<8x128xf32, #tpu.memory_space<vmem>>) attributes {dimension_semantics = [#tpu.dimension_semantics<parallel>], iteration_bounds = array<i64: 1>, scalar_prefetch = 0 : i64, scratch_operands = 0 : i64, tpu.core_type = #tpu.core_type<tc>, window_params = [{transform_indices = @transform_0, window_bounds = array<i64: 8, 64>}, {pipeline_mode = #tpu.pipeline_mode<synchronous>, transform_indices = @transform_1, window_bounds = array<i64: 64, 128>}, {pipeline_mode = #tpu.pipeline_mode<synchronous>, transform_indices = @transform_2, window_bounds = array<i64: 1, 128>}, {pipeline_mode = #tpu.pipeline_mode<synchronous>, transform_indices = @transform_3, window_bounds = array<i64: 128, 64>}, {pipeline_mode = #tpu.pipeline_mode<synchronous>, transform_indices = @transform_4, window_bounds = array<i64: 1, 64>}, {pipeline_mode = #tpu.pipeline_mode<synchronous>, transform_indices = @transform_5, window_bounds = array<i64: 64, 128>}, {pipeline_mode = #tpu.pipeline_mode<synchronous>, transform_indices = @transform_6, window_bounds = array<i64: 1, 128>}, {transform_indices = @transform_7, window_bounds = array<i64: 8, 128>}]} {
    %c0 = arith.constant 0 : index
    %c0_0 = arith.constant 0 : index
    %0 = vector.load %arg1[%c0, %c0_0] : memref<8x64xbf16, #tpu.memory_space<vmem>>, vector<8x64xbf16>
    %c0_1 = arith.constant 0 : index
    %c0_2 = arith.constant 0 : index
    %1 = vector.load %arg2[%c0_1, %c0_2] : memref<64x128xbf16, #tpu.memory_space<vmem>>, vector<64x128xbf16>
    %cst = arith.constant dense<0.000000e+00> : vector<8x128xf32>
    %2 = tpu.matmul %0, %1, %cst {dimension_numbers = #tpu.dot_dimension_numbers<[1], [0], [0], [1], [0, 0, 1, 1], [], []>} : vector<8x64xbf16>, vector<64x128xbf16>, vector<8x128xf32> -> vector<8x128xf32>
    %c0_3 = arith.constant 0 : index
    %c0_4 = arith.constant 0 : index
    %3 = vector.load %arg3[%c0_3, %c0_4] : memref<1x128xf32, #tpu.memory_space<vmem>>, vector<1x128xf32>
    %4 = vector.broadcast %3 : vector<1x128xf32> to vector<8x128xf32>
    %5 = arith.addf %2, %4 : vector<8x128xf32>
    %cst_5 = arith.constant 0.000000e+00 : f32
    %6 = vector.broadcast %cst_5 : f32 to vector<8x128xf32>
    %7 = arith.maximumf %5, %6 : vector<8x128xf32>
    %8 = arith.truncf %7 : vector<8x128xf32> to vector<8x128xbf16>
    %c0_6 = arith.constant 0 : index
    %c0_7 = arith.constant 0 : index
    %9 = vector.load %arg4[%c0_6, %c0_7] : memref<128x64xbf16, #tpu.memory_space<vmem>>, vector<128x64xbf16>
    %cst_8 = arith.constant dense<0.000000e+00> : vector<8x64xf32>
    %10 = tpu.matmul %8, %9, %cst_8 {dimension_numbers = #tpu.dot_dimension_numbers<[1], [0], [0], [1], [0, 0, 1, 1], [], []>} : vector<8x128xbf16>, vector<128x64xbf16>, vector<8x64xf32> -> vector<8x64xf32>
    %c0_9 = arith.constant 0 : index
    %c0_10 = arith.constant 0 : index
    %11 = vector.load %arg5[%c0_9, %c0_10] : memref<1x64xf32, #tpu.memory_space<vmem>>, vector<1x64xf32>
    %12 = vector.broadcast %11 : vector<1x64xf32> to vector<8x64xf32>
    %13 = arith.addf %10, %12 : vector<8x64xf32>
    %cst_11 = arith.constant 0.000000e+00 : f32
    %14 = vector.broadcast %cst_11 : f32 to vector<8x64xf32>
    %15 = arith.maximumf %13, %14 : vector<8x64xf32>
    %16 = arith.truncf %15 : vector<8x64xf32> to vector<8x64xbf16>
    %c0_12 = arith.constant 0 : index
    %c0_13 = arith.constant 0 : index
    %17 = vector.load %arg6[%c0_12, %c0_13] : memref<64x128xbf16, #tpu.memory_space<vmem>>, vector<64x128xbf16>
    %cst_14 = arith.constant dense<0.000000e+00> : vector<8x128xf32>
    %18 = tpu.matmul %16, %17, %cst_14 {dimension_numbers = #tpu.dot_dimension_numbers<[1], [0], [0], [1], [0, 0, 1, 1], [], []>} : vector<8x64xbf16>, vector<64x128xbf16>, vector<8x128xf32> -> vector<8x128xf32>
    %c0_15 = arith.constant 0 : index
    %c0_16 = arith.constant 0 : index
    %19 = vector.load %arg7[%c0_15, %c0_16] : memref<1x128xf32, #tpu.memory_space<vmem>>, vector<1x128xf32>
    %20 = vector.broadcast %19 : vector<1x128xf32> to vector<8x128xf32>
    %21 = arith.addf %18, %20 : vector<8x128xf32>
    %cst_17 = arith.constant dense<0xFF800000> : vector<8xf32>
    %22 = vector.multi_reduction <maximumf>, %21, %cst_17 [1] : vector<8x128xf32> to vector<8xf32>
    %23 = vector.shape_cast %22 : vector<8xf32> to vector<8x1xf32>
    %24 = vector.broadcast %23 : vector<8x1xf32> to vector<8x128xf32>
    %25 = arith.subf %21, %24 : vector<8x128xf32>
    %26 = math.exp %25 : vector<8x128xf32>
    %cst_18 = arith.constant dense<0.000000e+00> : vector<8xf32>
    %27 = vector.multi_reduction <add>, %26, %cst_18 [1] : vector<8x128xf32> to vector<8xf32>
    %28 = vector.shape_cast %27 : vector<8xf32> to vector<8x1xf32>
    %29 = tpu.reciprocal %28 {approx = true} : vector<8x1xf32> -> vector<8x1xf32>
    %30 = vector.broadcast %29 : vector<8x1xf32> to vector<8x128xf32>
    %31 = arith.mulf %26, %30 : vector<8x128xf32>
    %c0_19 = arith.constant 0 : index
    %c0_20 = arith.constant 0 : index
    %32 = vector.load %arg8[%c0_19, %c0_20] : memref<8x128xf32, #tpu.memory_space<vmem>>, vector<8x128xf32>
    tpu.vector_store %arg8[%c0_19, %c0_20], %31 {strides = array<i32>} : memref<8x128xf32, #tpu.memory_space<vmem>>, vector<8x128xf32>,
    return
  }
  func.func @transform_0(%arg0: i32) -> (i32, i32) {
    %c0_i32 = arith.constant 0 : i32
    %c0_i32_0 = arith.constant 0 : i32
    return %arg0, %c0_i32 : i32, i32
  }
  func.func @transform_1(%arg0: i32) -> (i32, i32) {
    %c0_i32 = arith.constant 0 : i32
    %c0_i32_0 = arith.constant 0 : i32
    %c0_i32_1 = arith.constant 0 : i32
    return %c0_i32, %c0_i32_0 : i32, i32
  }
  func.func @transform_2(%arg0: i32) -> (i32, i32) {
    %c0_i32 = arith.constant 0 : i32
    %c0_i32_0 = arith.constant 0 : i32
    %c0_i32_1 = arith.constant 0 : i32
    return %c0_i32, %c0_i32_0 : i32, i32
  }
  func.func @transform_3(%arg0: i32) -> (i32, i32) {
    %c0_i32 = arith.constant 0 : i32
    %c0_i32_0 = arith.constant 0 : i32
    %c0_i32_1 = arith.constant 0 : i32
    return %c0_i32, %c0_i32_0 : i32, i32
  }
  func.func @transform_4(%arg0: i32) -> (i32, i32) {
    %c0_i32 = arith.constant 0 : i32
    %c0_i32_0 = arith.constant 0 : i32
    %c0_i32_1 = arith.constant 0 : i32
    return %c0_i32, %c0_i32_0 : i32, i32
  }
  func.func @transform_5(%arg0: i32) -> (i32, i32) {
    %c0_i32 = arith.constant 0 : i32
    %c0_i32_0 = arith.constant 0 : i32
    %c0_i32_1 = arith.constant 0 : i32
    return %c0_i32, %c0_i32_0 : i32, i32
  }
  func.func @transform_6(%arg0: i32) -> (i32, i32) {
    %c0_i32 = arith.constant 0 : i32
    %c0_i32_0 = arith.constant 0 : i32
    %c0_i32_1 = arith.constant 0 : i32
    return %c0_i32, %c0_i32_0 : i32, i32
  }
  func.func @transform_7(%arg0: i32) -> (i32, i32) {
    %c0_i32 = arith.constant 0 : i32
    %c0_i32_0 = arith.constant 0 : i32
    return %arg0, %c0_i32 : i32, i32
  }
}

</mosaic_0001>

<bundles_post_ra>
// kernel: tpu_custom_call.1
= control target key start
LH: loop header
LB: loop body
LE: loop exit
PB: predicated region body
PF: predicated region fallthrough
CT: control target
= control target key end

     0   :  { %v464_v1 = vmov 0.0   ;;  %vm465_vm0 = vmmov 0   ;;  %vm68_vm1 = vcmask 523264   ;;  %s584_s0 = inlined_call_operand.vmem [shape: bf16[8,64], index: 0, kind: input, shape index: {}]   ;;  %s585_s1 = inlined_call_operand.vmem [shape: bf16[64,128], index: 1, kind: input, shape index: {}]   ;;  %s586_s2 = inlined_call_operand.vmem [shape: f32[1,128], index: 2, kind: input, shape index: {}]   ;;  %s587_s3 = inlined_call_operand.vmem [shape: bf16[128,64], index: 3, kind: input, shape index: {}]   ;;  %s588_s4 = inlined_call_operand.vmem [shape: f32[1,64], index: 4, kind: input, shape index: {}]   ;;  %s589_s5 = inlined_call_operand.vmem [shape: bf16[64,128], index: 5, kind: input, shape index: {}]   ;;  %s590_s6 = inlined_call_operand.vmem [shape: f32[1,128], index: 6, kind: input, shape index: {}]   ;;  %s591_s7 = inlined_call_operand.hbm [shape: f32[8,128], index: 7, kind: output, shape index: {}]  }
   0x1   :  { %v420_v0 = vld [vmem:[%s585_s1] sm:$0xff]   ;;  %373 = vmatprep.subr.bf16.mxu0 %v464_v1  ;;  %385 = vmatprep.subr.bf16.mxu1 %v464_v1  ;;  %v421_v2 = vld [vmem:[%s585_s1 + $0x8] sm:$0xff]   ;;  %v422_v4 = vld [vmem:[%s585_s1 + $0x10] sm:$0xff]  }
   0x2   :  { %374 = vmatpush3.bf16.msra.mxu0 %v420_v0  ;;  %381 = vmatprep.mubr.msk.bf16.mxu0 %vm465_vm0, %v464_v1  ;;  %v424_v3 = vld [vmem:[%s587_s3] sm:$0xff]   ;;  %v425_v5 = vld [vmem:[%s587_s3 + $0x8] sm:$0xff]   ;;  %v423_v6 = vld [vmem:[%s585_s1 + $0x18] sm:$0xff]  }
   0x3   :  { %375 = vmatprep.subr.bf16.mxu0 %v464_v1  ;;  %401 = vmatprep.mubr.msk.bf16.mxu1 %vm465_vm0, %v464_v1  ;;  %v426_v7 = vld [vmem:[%s587_s3 + $0x10] sm:$0xff]   ;;  %v28_v8 = vld [vmem:[%s584_s0] sm:$0xf] }
   0x4   :  { %386 = vmatpush3.bf16.msra.mxu1 %v424_v3 }
   0x5   :  { %387 = vmatprep.subr.bf16.mxu1 %v464_v1 }
   0x6   :  { %376 = vmatpush3.bf16.msra.mxu0 %v421_v2 }
   0x7   :  { %377 = vmatprep.subr.bf16.mxu0 %v464_v1 }
   0x8   :  { %388 = vmatpush3.bf16.msra.mxu1 %v425_v5 }
   0x9   :  { %389 = vmatprep.subr.bf16.mxu1 %v464_v1 }
   0xa   :  { %378 = vmatpush3.bf16.msra.mxu0 %v422_v4 }
   0xb   :  { %379 = vmatprep.subr.bf16.mxu0 %v464_v1 }
   0xe   :  { %380 = vmatpush3.bf16.msra.mxu0 %v423_v6 }
   0xf   :  { %12 = vsyncpa [#allocation3], 0  ;;  %390 = vmatpush3.bf16.msra.mxu1 %v426_v7  ;;  %v427_v9 = vld [vmem:[%s587_s3 + $0x18] sm:$0xff]   ;;  %405 = vmatprep.subr.bf16.mxu0 %v464_v1  ;;  %v428_v10 = vld [vmem:[%s587_s3 + $0x20] sm:$0xff]  }
  0x10   :  { %391 = vmatprep.subr.bf16.mxu1 %v464_v1  ;;  %v429_v11 = vld [vmem:[%s587_s3 + $0x28] sm:$0xff]   ;;  %v430_v12 = vld [vmem:[%s587_s3 + $0x30] sm:$0xff]   ;;  %v431_v13 = vld [vmem:[%s587_s3 + $0x38] sm:$0xff]  }
  0x11   :  { %382 = vmatmul.mubr.msk.bf16.vlgmr.msra.gmra.mrb[0].mxu0 %vm68_vm1, %v28_v8  ;;  %v432_v14 = vld [vmem:[%s589_s5] sm:$0xff]   ;;  %v433_v15 = vld [vmem:[%s589_s5 + $0x8] sm:$0xff]   ;;  %v434_v24 = vld [vmem:[%s589_s5 + $0x10] sm:$0xff]  }
  0x12   :  { %413 = vmatprep.mubr.msk.bf16.mxu0 %vm465_vm0, %v464_v1  ;;  %406 = vmatpush3.bf16.msra.mxu0 %v432_v14  ;;  %v333_v16 = vld [vmem:[%s586_s2] ss:$0 sm:$0xff]  ;;  %v435_v25 = vld [vmem:[%s589_s5 + $0x18] sm:$0xff]  }
  0x13   :  { %392 = vmatpush3.bf16.msra.mxu1 %v427_v9  ;;  %407 = vmatprep.subr.bf16.mxu0 %v464_v1  ;;  %v339_v26 = vld [vmem:[%s588_s4] ss:$0 sm:$0xff]  ;;  %s466_s4 = smov [#allocation2]  }
  0x14   :  { %393 = vmatprep.subr.bf16.mxu1 %v464_v1  ;;  %v348_v34 = vld [vmem:[%s590_s6] ss:$0 sm:$0xff]  ;;  %s325_s5 = sshll.u32 %s466_s4, 4  ;;  %s326_s5 = int_to_ptr.vmem [resolvable:$true] %s325_s5 }
  0x15   :  { %s440_s6 = scalar_lea.vmem %s326_s5, 128  ;;  %p445_p1 = scmp.lt.s32.totalorder %s326_s5, %s326_s5 }
  0x16   :  { %408 = vmatpush3.bf16.msra.mxu0 %v433_v15  ;;  %p441_p0 = scmp.ne.s32.totalorder %s326_s5, %s440_s6  ;;  %p446_p2 = scmp.lt.s32.totalorder %s440_s6, %s440_s6 }
  0x17   :  { %394 = vmatpush3.bf16.msra.mxu1 %v428_v10  ;;  %409 = vmatprep.subr.bf16.mxu0 %v464_v1 }
  0x18   :  { %395 = vmatprep.subr.bf16.mxu1 %v464_v1  ;;  %p447_p3 = por %p446_p2, %p445_p1 }
  0x1a   :  { %410 = vmatpush3.bf16.msra.mxu0 %v434_v24  ;;  %p448_p4 = pnand %p447_p3, %p441_p0 }
  0x1b   :  { %396 = vmatpush3.bf16.msra.mxu1 %v429_v11  ;;  %411 = vmatprep.subr.bf16.mxu0 %v464_v1 }
  0x1c   :  { %397 = vmatprep.subr.bf16.mxu1 %v464_v1 }
  0x1e   :  { %412 = vmatpush3.bf16.msra.mxu0 %v435_v25 }
  0x1f   :  { %398 = vmatpush3.bf16.msra.mxu1 %v430_v12 }
  0x20   :  { %399 = vmatprep.subr.bf16.mxu1 %v464_v1 }
  0x23   :  { %400 = vmatpush3.bf16.msra.mxu1 %v431_v13 }
  0xe4   :  { %v106_v17 = vpop.f32.mrb[0].mxu0 }
  0xe5   :  { %v107_v18 = vadd.f32 %v333_v16, %v106_v17  ;;  %v383_v19 = vpop.f32.mrb[1].mxu0 }
  0xe6   :  { %v109_v20 = vpop.f32.mrb[2].mxu0 }
  0xe7   :  { %v112_v21 = vmax.f32 %v107_v18, 0.0  ;;  %v384_v22 = vpop.f32.mrb[3].mxu0 }
  0xe9   :  { %v113_v23 = vpack.c.bf16 %v112_v21, %v112_v21 }
  0xeb   :  { %402 = vmatmul.mubr.bf16.vlgmr.msra.gmra.mrb[0].mxu1 %v113_v23 }
 0x1be   :  { %v219_v27 = vpop.f32.mrb[0].mxu1 }
 0x1bf   :  { %v220_v28 = vadd.f32 %v339_v26, %v219_v27  ;;  %v403_v29 = vpop.f32.mrb[1].mxu1 }
 0x1c0   :  { %v222_v30 = vpop.f32.mrb[2].mxu1 }
 0x1c1   :  { %v225_v31 = vmax.f32 %v220_v28, 0.0  ;;  %v404_v32 = vpop.f32.mrb[3].mxu1 }
 0x1c3   :  { %v226_v33 = vpack.c.bf16 %v225_v31, %v225_v31 }
 0x1c5   :  { %414 = vmatmul.mubr.msk.bf16.vlgmr.msra.gmra.mrb[4].mxu0 %vm68_vm1, %v226_v33 }
 0x298   :  { %v303_v35 = vpop.f32.mrb[4].mxu0 }
 0x299   :  { %v304_v36 = vadd.f32 %v348_v34, %v303_v35  ;;  %v415_v37 = vpop.f32.mrb[5].mxu0 }
 0x29a   :  { %v306_v38 = vpop.f32.mrb[6].mxu0 }
 0x29b   :  { %309 = vmax.xlane.f32.xlu0 %v304_v36  ;;  %v416_v39 = vpop.f32.mrb[7].mxu0 }
 0x328   :  { %v310_v40 = vpop.xlane.xlu0 %309 }
 0x329   :  { %v311_v41 = vsub.f32 %v304_v36, %v310_v40 }
 0x32b   :  { %v312_v42 = vmul.f32 1.442695, %v311_v41 }
 0x32d   :  { %436 = vpow2.f32 %v312_v42 }
 0x337   :  { %v437_v43 = vpop.eup %436 }
 0x338   :  { %314 = vadd.xlane.f32.xlu0 %v437_v43 }
 0x3c5   :  { %v315_v44 = vpop.xlane.xlu0 %314 }
 0x3c6   :  { %438 = vrcp.f32 %v315_v44 }
 0x3d0   :  { %v439_v45 = vpop.eup %438 }
 0x3d1   :  { %v317_v46 = vmul.f32 %v439_v45, %v437_v43 }
 0x3d3   :  { %318 = vst [vmem:[#allocation2] sm:$0xff] %v317_v46 }
 0x3d4   :  { %451 = shalt.err (!%p448_p4)
}
 0x3d5   :  { %s452_s16 = scalar_lea.hbm %s591_s7, 128 }
 0x3d6   :  { %p453_p5 = scmp.ne.s32.totalorder %s591_s7, %s452_s16  ;;  %p456_p6 = scmp.lt.u32.totalorder %s452_s16, %s591_s7 }
 0x3d8   :  { %p458_p7 = pnand %p456_p6, %p453_p5 }
 0x3da   :  { %461 = shalt.err (!%p458_p7)
}
 0x3db   :  { %328 = dma.vmem_to_hbm [thread:$0]  %s326_s5, 128, %s591_s7, [#allocation3]  }
 0x3dc   :  { %462 = dma.done.wait [#allocation3], 128  }
 0x3dd   :  { %463 = vsyncadd [#allocation3], 4294967168 }
 0x3de   :  { %332 = vsyncpa [#allocation3], 1 }

</bundles_post_ra>
